<compile_context>
chip_gen: v6e
topology: v6e:2x2x1
jax: 0.10.0
libtpu: 0.0.40
codegen_flags: <defaults>
</compile_context>

<pallas_src>
import math
import functools

import jax
import jax.numpy as jnp
from jax import lax
from jax.experimental import pallas as pl
from jax.experimental.pallas import tpu as pltpu


def cross_attn_block_kernel(seq_ref, kt_ref, v_ref, wq_ref, wh_ref,
                            gamma_ref, beta_ref, out_ref, *, num_heads, eps=1e-5):
    """One grid step = one (batch, query-tile).  All heads handled in-kernel."""
    seq_f32 = seq_ref[...]                         # (ts, D) f32 — kept for residual + LayerNorm
    seq_bf = seq_f32.astype(jnp.bfloat16)

    # Lane-dense full-width query projection (softmax scale already folded into Wq host-side).
    q = jnp.dot(seq_bf, wq_ref[...], preferred_element_type=jnp.float32)   # (ts, D)
    q_bf = q.astype(jnp.bfloat16)

    kt = kt_ref[...]                               # (D, T) bf16, pre-transposed (no XLU transpose)
    v = v_ref[...]                                 # (T, D) bf16

    D = q.shape[-1]
    d = D // num_heads

    # Static in-kernel head loop for the attention core (scores are inherently per-head / d-wide).
    ys = []
    for h in range(num_heads):
        q_h = q_bf[:, h * d:(h + 1) * d]           # (ts, d)
        kt_h = kt[h * d:(h + 1) * d, :]            # (d, T)   sublane slice
        v_h = v[:, h * d:(h + 1) * d]              # (T, d)

        s = jnp.dot(q_h, kt_h, preferred_element_type=jnp.float32)         # (ts, T) f32
        s = s - jnp.max(s, axis=-1, keepdims=True)
        p = jnp.exp(s)
        p = p / jnp.sum(p, axis=-1, keepdims=True)  # exact division: tiny vector, tighter parity
        ys.append(jnp.dot(p.astype(jnp.bfloat16), v_h,
                          preferred_element_type=jnp.float32).astype(jnp.bfloat16))

    y = jnp.concatenate(ys, axis=-1)                # (ts, D) bf16
    attn = jnp.dot(y, wh_ref[...], preferred_element_type=jnp.float32)     # (ts, D) f32
    # TODO(synk): dropout on attention probs / block output is identity (eval mode); not implemented.

    # Residual + LayerNorm (biased variance, eps=1e-5), all in f32.
    x = attn + seq_f32
    mean = jnp.mean(x, axis=-1, keepdims=True)
    xc = x - mean
    var = jnp.mean(xc * xc, axis=-1, keepdims=True)
    xhat = xc * lax.rsqrt(var + eps)
    out_ref[...] = (xhat * gamma_ref[...] + beta_ref[...]).astype(out_ref.dtype)


def cross_attention_block(seq, cond, params, num_heads, ts=256):
    """seq: (N, S, D), cond: (N, T, D). params hold PyTorch-convention weights (no Linear biases).

    Call this under jax.jit so the weight repack / K,V precompute fuses with the kernel launch.
    """
    N, S, D = seq.shape
    _, T, _ = cond.shape
    H = num_heads
    assert D % H == 0
    d = D // H
    ts = min(ts, S)
    assert S % ts == 0, "S must be divisible by the query tile size"

    cdt = jnp.bfloat16
    scale = 1.0 / math.sqrt(d)

    # nn.Linear stores W as (out, in) and computes x @ W.T.
    wq = (params["wq"].T * scale).astype(cdt)       # (D, D), softmax scale folded in
    wk = params["wk"].T.astype(cdt)
    wv = params["wv"].T.astype(cdt)
    wh = params["wh"].T.astype(cdt)

    gamma = params["gamma"].reshape(1, D).astype(jnp.float32)
    beta = params["beta"].reshape(1, D).astype(jnp.float32)

    # K / V depend only on cond, not on the query tile: compute them once here (lane-dense XLA
    # matmuls, bf16 inputs / f32 accumulation), K pre-transposed to (N, D, T) for QK^T.
    cond_bf = cond.astype(cdt)
    k = jnp.einsum("ntd,do->nto", cond_bf, wk, preferred_element_type=jnp.float32)
    kt = jnp.swapaxes(k, 1, 2).astype(cdt)          # (N, D, T)
    v = jnp.einsum("ntd,do->nto", cond_bf, wv, preferred_element_type=jnp.float32).astype(cdt)

    kernel = functools.partial(cross_attn_block_kernel, num_heads=H)

    # TODO(synk): for very long cond (T >~ 2K) on v7x, tile T with an online softmax to cap VMEM.
    return pl.pallas_call(
        kernel,
        out_shape=jax.ShapeDtypeStruct((N, S, D), seq.dtype),
        grid_spec=pltpu.PrefetchScalarGridSpec(
            num_scalar_prefetch=0,
            grid=(N, S // ts),
            in_specs=[
                pl.BlockSpec((None, ts, D), lambda n, s: (n, s, 0)),   # seq tile (f32)
                pl.BlockSpec((None, D, T), lambda n, s: (n, 0, 0)),    # K^T (bf16), per batch
                pl.BlockSpec((None, T, D), lambda n, s: (n, 0, 0)),    # V   (bf16), per batch
                pl.BlockSpec((D, D), lambda n, s: (0, 0)),             # Wq (scaled) — VMEM-resident
                pl.BlockSpec((D, D), lambda n, s: (0, 0)),             # Wh          — VMEM-resident
                pl.BlockSpec((1, D), lambda n, s: (0, 0)),             # gamma
                pl.BlockSpec((1, D), lambda n, s: (0, 0)),             # beta
            ],
            out_specs=pl.BlockSpec((None, ts, D), lambda n, s: (n, s, 0)),
        ),
        compiler_params=pltpu.CompilerParams(
            dimension_semantics=("parallel", "parallel"),
            vmem_limit_bytes=64 * 1024 * 1024,
        ),
    )(seq, kt, v, wq, wh, gamma, beta)


def cross_attention_block_ref(seq, cond, params, num_heads):
    """Pure-JAX f32 reference with PyTorch semantics (eval mode)."""
    N, S, D = seq.shape
    _, T, _ = cond.shape
    d = D // num_heads

    q = seq @ params["wq"].T
    k = cond @ params["wk"].T
    v = cond @ params["wv"].T

    q = q.reshape(N, S, num_heads, d).transpose(0, 2, 1, 3)
    k = k.reshape(N, T, num_heads, d).transpose(0, 2, 1, 3)
    v = v.reshape(N, T, num_heads, d).transpose(0, 2, 1, 3)

    dot = jnp.einsum("nhsd,nhtd->nhst", q, k) / math.sqrt(d)
    scores = jax.nn.softmax(dot, axis=-1)
    y = jnp.einsum("nhst,nhtd->nhsd", scores, v)
    y = y.transpose(0, 2, 1, 3).reshape(N, S, D)
    out = y @ params["wh"].T

    x = out + seq
    mean = jnp.mean(x, axis=-1, keepdims=True)
    var = jnp.mean((x - mean) ** 2, axis=-1, keepdims=True)
    xhat = (x - mean) / jnp.sqrt(var + 1e-5)
    return xhat * params["gamma"] + params["beta"]


if __name__ == "__main__":
    # Small but lane-dense shapes: D multiple of 128, S split into two query tiles.
    N, S, T, D, H = 2, 32, 16, 128, 4

    key = jax.random.PRNGKey(0)
    ks = jax.random.split(key, 8)
    seq = jax.random.normal(ks[0], (N, S, D), dtype=jnp.float32)
    cond = jax.random.normal(ks[1], (N, T, D), dtype=jnp.float32)

    lim = 1.0 / math.sqrt(D)
    params = {
        "wq": jax.random.uniform(ks[2], (D, D), jnp.float32, -lim, lim),
        "wk": jax.random.uniform(ks[3], (D, D), jnp.float32, -lim, lim),
        "wv": jax.random.uniform(ks[4], (D, D), jnp.float32, -lim, lim),
        "wh": jax.random.uniform(ks[5], (D, D), jnp.float32, -lim, lim),
        "gamma": jnp.ones((D,), jnp.float32),
        "beta": jnp.zeros((D,), jnp.float32),
    }

    # jit the full wrapper so weight repacking + K/V precompute run fused, not eagerly per call.
    fn = jax.jit(functools.partial(cross_attention_block, num_heads=H, ts=16))
    out = jax.block_until_ready(fn(seq, cond, params))

    ref = cross_attention_block_ref(seq, cond, params, num_heads=H)
    assert out.shape == (N, S, D)
    # bf16 matmul inputs (f32 accumulation) -> loosened tolerance vs the pure-f32 reference.
    assert jnp.allclose(out, ref, atol=5e-2, rtol=5e-2), (
        f"max abs err {jnp.max(jnp.abs(out - ref))}")
    print("KERNEL_OK")
</pallas_src>

<mosaic_0001>
module attributes {stable_mosaic.version = 11 : i64} {
  func.func @cross_attn_block_kernel(%arg0: i32, %arg1: i32, %arg2: memref<1x16x128xf32, #tpu.memory_space<vmem>>, %arg3: memref<1x128x16xbf16, #tpu.memory_space<vmem>>, %arg4: memref<1x16x128xbf16, #tpu.memory_space<vmem>>, %arg5: memref<128x128xbf16, #tpu.memory_space<vmem>>, %arg6: memref<128x128xbf16, #tpu.memory_space<vmem>>, %arg7: memref<1x128xf32, #tpu.memory_space<vmem>>, %arg8: memref<1x128xf32, #tpu.memory_space<vmem>>, %arg9: memref<1x16x128xf32, #tpu.memory_space<vmem>>) attributes {dimension_semantics = [#tpu.dimension_semantics<parallel>, #tpu.dimension_semantics<parallel>], iteration_bounds = array<i64: 2, 2>, scalar_prefetch = 0 : i64, scratch_operands = 0 : i64, tpu.core_type = #tpu.core_type<tc>, window_params = [{transform_indices = @transform_0, window_bounds = array<i64: 1, 16, 128>}, {transform_indices = @transform_1, window_bounds = array<i64: 1, 128, 16>}, {transform_indices = @transform_2, window_bounds = array<i64: 1, 16, 128>}, {pipeline_mode = #tpu.pipeline_mode<synchronous>, transform_indices = @transform_3, window_bounds = array<i64: 128, 128>}, {pipeline_mode = #tpu.pipeline_mode<synchronous>, transform_indices = @transform_4, window_bounds = array<i64: 128, 128>}, {pipeline_mode = #tpu.pipeline_mode<synchronous>, transform_indices = @transform_5, window_bounds = array<i64: 1, 128>}, {pipeline_mode = #tpu.pipeline_mode<synchronous>, transform_indices = @transform_6, window_bounds = array<i64: 1, 128>}, {transform_indices = @transform_7, window_bounds = array<i64: 1, 16, 128>}]} {
    %c0 = arith.constant 0 : index
    %c0_0 = arith.constant 0 : index
    %c0_1 = arith.constant 0 : index
    %0 = vector.load %arg2[%c0, %c0_0, %c0_1] : memref<1x16x128xf32, #tpu.memory_space<vmem>>, vector<1x16x128xf32>
    %1 = vector.shape_cast %0 : vector<1x16x128xf32> to vector<16x128xf32>
    %2 = arith.truncf %1 : vector<16x128xf32> to vector<16x128xbf16>
    %c0_2 = arith.constant 0 : index
    %c0_3 = arith.constant 0 : index
    %3 = vector.load %arg5[%c0_2, %c0_3] : memref<128x128xbf16, #tpu.memory_space<vmem>>, vector<128x128xbf16>
    %cst = arith.constant dense<0.000000e+00> : vector<16x128xf32>
    %4 = tpu.matmul %2, %3, %cst {dimension_numbers = #tpu.dot_dimension_numbers<[1], [0], [0], [1], [0, 0, 1, 1], [], []>} : vector<16x128xbf16>, vector<128x128xbf16>, vector<16x128xf32> -> vector<16x128xf32>
    %5 = arith.truncf %4 : vector<16x128xf32> to vector<16x128xbf16>
    %c0_4 = arith.constant 0 : index
    %c0_5 = arith.constant 0 : index
    %c0_6 = arith.constant 0 : index
    %6 = vector.load %arg3[%c0_4, %c0_5, %c0_6] : memref<1x128x16xbf16, #tpu.memory_space<vmem>>, vector<1x128x16xbf16>
    %7 = vector.shape_cast %6 : vector<1x128x16xbf16> to vector<128x16xbf16>
    %c0_7 = arith.constant 0 : index
    %c0_8 = arith.constant 0 : index
    %c0_9 = arith.constant 0 : index
    %8 = vector.load %arg4[%c0_7, %c0_8, %c0_9] : memref<1x16x128xbf16, #tpu.memory_space<vmem>>, vector<1x16x128xbf16>
    %9 = vector.shape_cast %8 : vector<1x16x128xbf16> to vector<16x128xbf16>
    %10 = vector.extract_strided_slice %5 {offsets = [0, 0], sizes = [16, 32], strides = [1, 1]} : vector<16x128xbf16> to vector<16x32xbf16>
    %11 = vector.extract_strided_slice %7 {offsets = [0, 0], sizes = [32, 16], strides = [1, 1]} : vector<128x16xbf16> to vector<32x16xbf16>
    %12 = vector.extract_strided_slice %9 {offsets = [0, 0], sizes = [16, 32], strides = [1, 1]} : vector<16x128xbf16> to vector<16x32xbf16>
    %cst_10 = arith.constant dense<0.000000e+00> : vector<16x16xf32>
    %13 = tpu.matmul %10, %11, %cst_10 {dimension_numbers = #tpu.dot_dimension_numbers<[1], [0], [0], [1], [0, 0, 1, 1], [], []>} : vector<16x32xbf16>, vector<32x16xbf16>, vector<16x16xf32> -> vector<16x16xf32>
    %cst_11 = arith.constant dense<0xFF800000> : vector<16xf32>
    %14 = vector.multi_reduction <maximumf>, %13, %cst_11 [1] : vector<16x16xf32> to vector<16xf32>
    %15 = vector.shape_cast %14 : vector<16xf32> to vector<16x1xf32>
    %16 = vector.broadcast %15 : vector<16x1xf32> to vector<16x16xf32>
    %17 = arith.subf %13, %16 : vector<16x16xf32>
    %18 = math.exp %17 : vector<16x16xf32>
    %cst_12 = arith.constant dense<0.000000e+00> : vector<16xf32>
    %19 = vector.multi_reduction <add>, %18, %cst_12 [1] : vector<16x16xf32> to vector<16xf32>
    %20 = vector.shape_cast %19 : vector<16xf32> to vector<16x1xf32>
    %21 = vector.broadcast %20 : vector<16x1xf32> to vector<16x16xf32>
    %22 = arith.divf %18, %21 : vector<16x16xf32>
    %23 = arith.truncf %22 : vector<16x16xf32> to vector<16x16xbf16>
    %cst_13 = arith.constant dense<0.000000e+00> : vector<16x32xf32>
    %24 = tpu.matmul %23, %12, %cst_13 {dimension_numbers = #tpu.dot_dimension_numbers<[1], [0], [0], [1], [0, 0, 1, 1], [], []>} : vector<16x16xbf16>, vector<16x32xbf16>, vector<16x32xf32> -> vector<16x32xf32>
    %25 = arith.truncf %24 : vector<16x32xf32> to vector<16x32xbf16>
    %26 = vector.extract_strided_slice %5 {offsets = [0, 32], sizes = [16, 32], strides = [1, 1]} : vector<16x128xbf16> to vector<16x32xbf16>
    %27 = vector.extract_strided_slice %7 {offsets = [32, 0], sizes = [32, 16], strides = [1, 1]} : vector<128x16xbf16> to vector<32x16xbf16>
    %28 = vector.extract_strided_slice %9 {offsets = [0, 32], sizes = [16, 32], strides = [1, 1]} : vector<16x128xbf16> to vector<16x32xbf16>
    %cst_14 = arith.constant dense<0.000000e+00> : vector<16x16xf32>
    %29 = tpu.matmul %26, %27, %cst_14 {dimension_numbers = #tpu.dot_dimension_numbers<[1], [0], [0], [1], [0, 0, 1, 1], [], []>} : vector<16x32xbf16>, vector<32x16xbf16>, vector<16x16xf32> -> vector<16x16xf32>
    %cst_15 = arith.constant dense<0xFF800000> : vector<16xf32>
    %30 = vector.multi_reduction <maximumf>, %29, %cst_15 [1] : vector<16x16xf32> to vector<16xf32>
    %31 = vector.shape_cast %30 : vector<16xf32> to vector<16x1xf32>
    %32 = vector.broadcast %31 : vector<16x1xf32> to vector<16x16xf32>
    %33 = arith.subf %29, %32 : vector<16x16xf32>
    %34 = math.exp %33 : vector<16x16xf32>
    %cst_16 = arith.constant dense<0.000000e+00> : vector<16xf32>
    %35 = vector.multi_reduction <add>, %34, %cst_16 [1] : vector<16x16xf32> to vector<16xf32>
    %36 = vector.shape_cast %35 : vector<16xf32> to vector<16x1xf32>
    %37 = vector.broadcast %36 : vector<16x1xf32> to vector<16x16xf32>
    %38 = arith.divf %34, %37 : vector<16x16xf32>
    %39 = arith.truncf %38 : vector<16x16xf32> to vector<16x16xbf16>
    %cst_17 = arith.constant dense<0.000000e+00> : vector<16x32xf32>
    %40 = tpu.matmul %39, %28, %cst_17 {dimension_numbers = #tpu.dot_dimension_numbers<[1], [0], [0], [1], [0, 0, 1, 1], [], []>} : vector<16x16xbf16>, vector<16x32xbf16>, vector<16x32xf32> -> vector<16x32xf32>
    %41 = arith.truncf %40 : vector<16x32xf32> to vector<16x32xbf16>
    %42 = vector.extract_strided_slice %5 {offsets = [0, 64], sizes = [16, 32], strides = [1, 1]} : vector<16x128xbf16> to vector<16x32xbf16>
    %43 = vector.extract_strided_slice %7 {offsets = [64, 0], sizes = [32, 16], strides = [1, 1]} : vector<128x16xbf16> to vector<32x16xbf16>
    %44 = vector.extract_strided_slice %9 {offsets = [0, 64], sizes = [16, 32], strides = [1, 1]} : vector<16x128xbf16> to vector<16x32xbf16>
    %cst_18 = arith.constant dense<0.000000e+00> : vector<16x16xf32>
    %45 = tpu.matmul %42, %43, %cst_18 {dimension_numbers = #tpu.dot_dimension_numbers<[1], [0], [0], [1], [0, 0, 1, 1], [], []>} : vector<16x32xbf16>, vector<32x16xbf16>, vector<16x16xf32> -> vector<16x16xf32>
    %cst_19 = arith.constant dense<0xFF800000> : vector<16xf32>
    %46 = vector.multi_reduction <maximumf>, %45, %cst_19 [1] : vector<16x16xf32> to vector<16xf32>
    %47 = vector.shape_cast %46 : vector<16xf32> to vector<16x1xf32>
    %48 = vector.broadcast %47 : vector<16x1xf32> to vector<16x16xf32>
    %49 = arith.subf %45, %48 : vector<16x16xf32>
    %50 = math.exp %49 : vector<16x16xf32>
    %cst_20 = arith.constant dense<0.000000e+00> : vector<16xf32>
    %51 = vector.multi_reduction <add>, %50, %cst_20 [1] : vector<16x16xf32> to vector<16xf32>
    %52 = vector.shape_cast %51 : vector<16xf32> to vector<16x1xf32>
    %53 = vector.broadcast %52 : vector<16x1xf32> to vector<16x16xf32>
    %54 = arith.divf %50, %53 : vector<16x16xf32>
    %55 = arith.truncf %54 : vector<16x16xf32> to vector<16x16xbf16>
    %cst_21 = arith.constant dense<0.000000e+00> : vector<16x32xf32>
    %56 = tpu.matmul %55, %44, %cst_21 {dimension_numbers = #tpu.dot_dimension_numbers<[1], [0], [0], [1], [0, 0, 1, 1], [], []>} : vector<16x16xbf16>, vector<16x32xbf16>, vector<16x32xf32> -> vector<16x32xf32>
    %57 = arith.truncf %56 : vector<16x32xf32> to vector<16x32xbf16>
    %58 = vector.extract_strided_slice %5 {offsets = [0, 96], sizes = [16, 32], strides = [1, 1]} : vector<16x128xbf16> to vector<16x32xbf16>
    %59 = vector.extract_strided_slice %7 {offsets = [96, 0], sizes = [32, 16], strides = [1, 1]} : vector<128x16xbf16> to vector<32x16xbf16>
    %60 = vector.extract_strided_slice %9 {offsets = [0, 96], sizes = [16, 32], strides = [1, 1]} : vector<16x128xbf16> to vector<16x32xbf16>
    %cst_22 = arith.constant dense<0.000000e+00> : vector<16x16xf32>
    %61 = tpu.matmul %58, %59, %cst_22 {dimension_numbers = #tpu.dot_dimension_numbers<[1], [0], [0], [1], [0, 0, 1, 1], [], []>} : vector<16x32xbf16>, vector<32x16xbf16>, vector<16x16xf32> -> vector<16x16xf32>
    %cst_23 = arith.constant dense<0xFF800000> : vector<16xf32>
    %62 = vector.multi_reduction <maximumf>, %61, %cst_23 [1] : vector<16x16xf32> to vector<16xf32>
    %63 = vector.shape_cast %62 : vector<16xf32> to vector<16x1xf32>
    %64 = vector.broadcast %63 : vector<16x1xf32> to vector<16x16xf32>
    %65 = arith.subf %61, %64 : vector<16x16xf32>
    %66 = math.exp %65 : vector<16x16xf32>
    %cst_24 = arith.constant dense<0.000000e+00> : vector<16xf32>
    %67 = vector.multi_reduction <add>, %66, %cst_24 [1] : vector<16x16xf32> to vector<16xf32>
    %68 = vector.shape_cast %67 : vector<16xf32> to vector<16x1xf32>
    %69 = vector.broadcast %68 : vector<16x1xf32> to vector<16x16xf32>
    %70 = arith.divf %66, %69 : vector<16x16xf32>
    %71 = arith.truncf %70 : vector<16x16xf32> to vector<16x16xbf16>
    %cst_25 = arith.constant dense<0.000000e+00> : vector<16x32xf32>
    %72 = tpu.matmul %71, %60, %cst_25 {dimension_numbers = #tpu.dot_dimension_numbers<[1], [0], [0], [1], [0, 0, 1, 1], [], []>} : vector<16x16xbf16>, vector<16x32xbf16>, vector<16x32xf32> -> vector<16x32xf32>
    %73 = arith.truncf %72 : vector<16x32xf32> to vector<16x32xbf16>
    %74 = tpu.concatenate %25, %41, %57, %73 in 1 : vector<16x32xbf16>, vector<16x32xbf16>, vector<16x32xbf16>, vector<16x32xbf16> -> vector<16x128xbf16>
    %c0_26 = arith.constant 0 : index
    %c0_27 = arith.constant 0 : index
    %75 = vector.load %arg6[%c0_26, %c0_27] : memref<128x128xbf16, #tpu.memory_space<vmem>>, vector<128x128xbf16>
    %cst_28 = arith.constant dense<0.000000e+00> : vector<16x128xf32>
    %76 = tpu.matmul %74, %75, %cst_28 {dimension_numbers = #tpu.dot_dimension_numbers<[1], [0], [0], [1], [0, 0, 1, 1], [], []>} : vector<16x128xbf16>, vector<128x128xbf16>, vector<16x128xf32> -> vector<16x128xf32>
    %77 = arith.addf %76, %1 : vector<16x128xf32>
    %cst_29 = arith.constant dense<0.000000e+00> : vector<16xf32>
    %78 = vector.multi_reduction <add>, %77, %cst_29 [1] : vector<16x128xf32> to vector<16xf32>
    %79 = vector.shape_cast %78 : vector<16xf32> to vector<16x1xf32>
    %cst_30 = arith.constant 1.280000e+02 : f32
    %80 = vector.broadcast %cst_30 : f32 to vector<16x1xf32>
    %81 = arith.divf %79, %80 : vector<16x1xf32>
    %82 = vector.broadcast %81 : vector<16x1xf32> to vector<16x128xf32>
    %83 = arith.subf %77, %82 : vector<16x128xf32>
    %84 = arith.mulf %83, %83 : vector<16x128xf32>
    %cst_31 = arith.constant dense<0.000000e+00> : vector<16xf32>
    %85 = vector.multi_reduction <add>, %84, %cst_31 [1] : vector<16x128xf32> to vector<16xf32>
    %86 = vector.shape_cast %85 : vector<16xf32> to vector<16x1xf32>
    %cst_32 = arith.constant 1.280000e+02 : f32
    %87 = vector.broadcast %cst_32 : f32 to vector<16x1xf32>
    %88 = arith.divf %86, %87 : vector<16x1xf32>
    %cst_33 = arith.constant 9.99999974E-6 : f32
    %89 = vector.broadcast %cst_33 : f32 to vector<16x1xf32>
    %90 = arith.addf %88, %89 : vector<16x1xf32>
    %91 = math.rsqrt %90 : vector<16x1xf32>
    %92 = vector.broadcast %91 : vector<16x1xf32> to vector<16x128xf32>
    %93 = arith.mulf %83, %92 : vector<16x128xf32>
    %c0_34 = arith.constant 0 : index
    %c0_35 = arith.constant 0 : index
    %94 = vector.load %arg7[%c0_34, %c0_35] : memref<1x128xf32, #tpu.memory_space<vmem>>, vector<1x128xf32>
    %95 = vector.broadcast %94 : vector<1x128xf32> to vector<16x128xf32>
    %96 = arith.mulf %93, %95 : vector<16x128xf32>
    %c0_36 = arith.constant 0 : index
    %c0_37 = arith.constant 0 : index
    %97 = vector.load %arg8[%c0_36, %c0_37] : memref<1x128xf32, #tpu.memory_space<vmem>>, vector<1x128xf32>
    %98 = vector.broadcast %97 : vector<1x128xf32> to vector<16x128xf32>
    %99 = arith.addf %96, %98 : vector<16x128xf32>
    %c0_38 = arith.constant 0 : index
    %c0_39 = arith.constant 0 : index
    %c0_40 = arith.constant 0 : index
    %100 = vector.load %arg9[%c0_38, %c0_39, %c0_40] : memref<1x16x128xf32, #tpu.memory_space<vmem>>, vector<1x16x128xf32>
    %101 = vector.shape_cast %100 : vector<1x16x128xf32> to vector<16x128xf32>
    %102 = vector.shape_cast %99 : vector<16x128xf32> to vector<1x16x128xf32>
    tpu.vector_store %arg9[%c0_38, %c0_39, %c0_40], %102 {strides = array<i32>} : memref<1x16x128xf32, #tpu.memory_space<vmem>>, vector<1x16x128xf32>,
    return
  }
  func.func @transform_0(%arg0: i32, %arg1: i32) -> (i32, i32, i32) {
    %c0_i32 = arith.constant 0 : i32
    %c0_i32_0 = arith.constant 0 : i32
    return %arg0, %arg1, %c0_i32 : i32, i32, i32
  }
  func.func @transform_1(%arg0: i32, %arg1: i32) -> (i32, i32, i32) {
    %c0_i32 = arith.constant 0 : i32
    %c0_i32_0 = arith.constant 0 : i32
    %c0_i32_1 = arith.constant 0 : i32
    return %arg0, %c0_i32, %c0_i32_0 : i32, i32, i32
  }
  func.func @transform_2(%arg0: i32, %arg1: i32) -> (i32, i32, i32) {
    %c0_i32 = arith.constant 0 : i32
    %c0_i32_0 = arith.constant 0 : i32
    %c0_i32_1 = arith.constant 0 : i32
    return %arg0, %c0_i32, %c0_i32_0 : i32, i32, i32
  }
  func.func @transform_3(%arg0: i32, %arg1: i32) -> (i32, i32) {
    %c0_i32 = arith.constant 0 : i32
    %c0_i32_0 = arith.constant 0 : i32
    %c0_i32_1 = arith.constant 0 : i32
    return %c0_i32, %c0_i32_0 : i32, i32
  }
  func.func @transform_4(%arg0: i32, %arg1: i32) -> (i32, i32) {
    %c0_i32 = arith.constant 0 : i32
    %c0_i32_0 = arith.constant 0 : i32
    %c0_i32_1 = arith.constant 0 : i32
    return %c0_i32, %c0_i32_0 : i32, i32
  }
  func.func @transform_5(%arg0: i32, %arg1: i32) -> (i32, i32) {
    %c0_i32 = arith.constant 0 : i32
    %c0_i32_0 = arith.constant 0 : i32
    %c0_i32_1 = arith.constant 0 : i32
    return %c0_i32, %c0_i32_0 : i32, i32
  }
  func.func @transform_6(%arg0: i32, %arg1: i32) -> (i32, i32) {
    %c0_i32 = arith.constant 0 : i32
    %c0_i32_0 = arith.constant 0 : i32
    %c0_i32_1 = arith.constant 0 : i32
    return %c0_i32, %c0_i32_0 : i32, i32
  }
  func.func @transform_7(%arg0: i32, %arg1: i32) -> (i32, i32, i32) {
    %c0_i32 = arith.constant 0 : i32
    %c0_i32_0 = arith.constant 0 : i32
    return %arg0, %arg1, %c0_i32 : i32, i32, i32
  }
}

</mosaic_0001>

<bundles_post_ra>
// kernel: cross_attention_block.1
= control target key start
LH: loop header
LB: loop body
LE: loop exit
PB: predicated region body
PF: predicated region fallthrough
CT: control target
= control target key end

     0   :  { %12 = vsyncpa [#allocation3], 0  ;;  %s2093_s0 = inlined_call_operand.vmem [shape: f32[2,32,128], index: 0, kind: input, shape index: {}]   ;;  %s2094_s1 = inlined_call_operand.vmem [shape: bf16[2,128,16], index: 1, kind: input, shape index: {}]   ;;  %s2095_s2 = inlined_call_operand.vmem [shape: bf16[2,16,128], index: 2, kind: input, shape index: {}]   ;;  %s2096_s3 = inlined_call_operand.vmem [shape: bf16[128,128], index: 3, kind: input, shape index: {}]   ;;  %s2097_s4 = inlined_call_operand.vmem [shape: bf16[128,128], index: 4, kind: input, shape index: {}]   ;;  %s2098_s5 = inlined_call_operand.vmem [shape: f32[1,128], index: 5, kind: input, shape index: {}]   ;;  %s2099_s6 = inlined_call_operand.vmem [shape: f32[1,128], index: 6, kind: input, shape index: {}]   ;;  %s2100_s7 = inlined_call_operand.hbm [shape: f32[2,32,128], index: 7, kind: output, shape index: {}]  }
   0x1   :  { %14 = vsyncpa [#allocation3 + $0x1], 0  ;;  %s1756_s24 = smov 0   ;;  %s1758_s25 = smov 0  }
   0x2   :  { %s1760_s26 = smov 0   ;;  %s1762_s27 = smov 0  }
   0x3   :  { %s1764_s28 = smov 0   ;;  %s1766_s29 = smov 0  }
   0x4   :  { %s1768_s30 = smov 0   ;;  %s1770_s8 = smov 0  }
   0x5 LB: > { %2104 = sst [smem:[#allocation5_spill]] %s1702_s30  ;;  %s1285_s9 = sadd.s32 4294967295, %s1706_s8   ;;  %s1706_s8 = sphi %s1770_s8, %s20_s8   ;;  %s1702_s30 = sphi %s1768_s30, %s2111_s30   ;;  %s1698_s29 = sphi %s1766_s29, %s2116_s29   ;;  %s1694_s28 = sphi %s1764_s28, %s2109_s28   ;;  %s1690_s27 = sphi %s1762_s27, %s2115_s27   ;;  %s1686_s26 = sphi %s1760_s26, %s2114_s26   ;;  %s1682_s25 = sphi %s1758_s25, %s2113_s25   ;;  %s1678_s24 = sphi %s1756_s24, %s2112_s24  }
   0x6   : > { %s1286_s10 = sadd.s32 4294967294, %s1706_s8   ;;  %s29_s11 = sadd.s32 1, %s1698_s29 }
   0x7   : > { %p30_p0 = scmp.ge.s32.totalorder %s29_s11, 2  ;;  %s32_s12 = sadd.s32 1, %s1702_s30 }
   0x8   : > { %p215_p1 = scmp.ne.s32.totalorder %s1686_s26, %s1682_s25  ;;  %p216_p2 = scmp.eq.s32.totalorder %s1285_s9, 3 }
   0x9   : > { %s2118_s11 = smov (%p30_p0, %s29_s11), 0  ;;  %s2120_s12 = smov (!%p30_p0, %s32_s12), %s1702_s30 }
   0xa   : > { %2105 = sst [smem:[#allocation6_spill]] %s2118_s11  ;;  %s201_s13 = ssub.s32 %s1698_s29, %s2118_s11 }
   0xb   : > { %p1807_p3 = por %p216_p2, %p215_p1  ;;  %p34_p4 = scmp.ge.s32.totalorder %s2120_s12, 2 }
   0xc   : > { %p221_p5 = scmp.ne.s32.totalorder %s1682_s25, %s1678_s24  ;;  %p222_p6 = scmp.eq.s32.totalorder %s1286_s10, 3 }
   0xd   : > { %p1289_p7 = scmp.ge.s32.totalorder %s1706_s8, 1  ;;  %s2122_s12 = smov (%p34_p4, %s2120_s12), 0 }
   0xe   : > { %2107 = sst [smem:[#allocation7_spill]] %s2122_s12  ;;  %p1816_p8 = por %p222_p6, %p221_p5 }
   0xf   : > { %p281_p9 = scmp.lt.s32.totalorder %s1706_s8, 5  ;;  %s200_s16 = ssub.s32 %s1702_s30, %s2122_s12 }
  0x10   : > { %s205_s17 = sadd.s32 1, %s1686_s26  ;;  %s202_s18 = sor.u32 %s201_s13, %s200_s16 }
  0x11   : > { %p282_p10 = pnand %p1289_p7, %p281_p9  ;;  %p203_p11 = scmp.eq.s32.totalorder %s202_s18, 0 }
  0x12   : > { %s1838_s9 = sshll.u32 (!%p282_p10), %s1690_s27, 1  ;;  %p328_p12 = scmp.lt.s32.totalorder (!%p282_p10), %s1694_s28, 1 }
  0x13   : > { %s1825_s19 = scalar_select %p203_p11, %s1686_s26, %s205_s17  }
  0x14   : > { %285 = sbr.rel (%p282_p10) target bundleno = 3159 (0xc57), region = 48  ;;  %p330_p13 = scmp.lt.s32.totalorder (!%p282_p10), %s1838_s9, 3 }
  0x15   : > { %s1335_s30 = sshll.u32 (!%p282_p10), %s1694_s28, 2  ;;  %s1713_s11 = smov (!%p282_p10), [#allocation2]  }
  0x19   : > { %v1553_v0 = vld [vmem:[%s2096_s3 + $0x38] sm:$0xff]   ;;  %v1708_v1 = vmov 0.0   ;;  %v1554_v2 = vld [vmem:[%s2096_s3 + $0x30] sm:$0xff]   ;;  %vm1709_vm0 = vmmov 0   ;;  %v1555_v3 = vld [vmem:[%s2096_s3 + $0x28] sm:$0xff]   ;;  %s1849_s16 = scalar_select %p328_p12, %s1694_s28, 1 }
  0x1a   : > { %1379 = vmatprep.subr.bf16.mxu0 %v1708_v1  ;;  %1399 = vmatprep.subr.bf16.mxu1 %v1708_v1  ;;  %s331_s27 = scalar_select %p330_p13, %s1838_s9, 3  ;;  %v1556_v4 = vld [vmem:[%s2096_s3 + $0x20] sm:$0xff]   ;;  %v1557_v5 = vld [vmem:[%s2096_s3 + $0x18] sm:$0xff]   ;;  %v1558_v6 = vld [vmem:[%s2096_s3 + $0x10] sm:$0xff]   ;;  %vm488_vm1 = vcmask 261120   ;;  %vm533_vm2 = vcmask 130048  }
  0x1b   : > { %1380 = vmatpush3.bf16.msra.mxu0 %v1553_v0  ;;  %1395 = vmatprep.mubr.msk.bf16.mxu0 %vm1709_vm0, %v1708_v1  ;;  %s1339_s17 = sshll.u32 %s1849_s16, 6  ;;  %s1292_s10 = sshll.u32 %s1849_s16, 2  ;;  %v1559_v7 = vld [vmem:[%s2096_s3 + $0x8] sm:$0xff]   ;;  %v1560_v8 = vld [vmem:[%s2096_s3] sm:$0xff]   ;;  %vm1008_vm3 = vcmask 523264   ;;  %vm1011_vm4 = vcmask 785408  }
  0x1c   : > { %1381 = vmatprep.subr.bf16.mxu0 %v1708_v1  ;;  %1403 = vmatprep.mubr.msk.bf16.mxu1 %vm1709_vm0, %v1708_v1  ;;  %s1860_s23 = scalar_lea.vmem %s2094_s1, %s1339_s17  ;;  %s333_s18 = sadd.s32 %s1292_s10, %s331_s27 }
  0x1d   : > { %s1293_s17 = sshll.u32 %s333_s18, 3  ;;  %v1561_v12 = vld [vmem:[%s1860_s23 + $0x8] sm:$0xff]   ;;  %v1562_v13 = vld [vmem:[%s1860_s23] sm:$0xff]   ;;  %s1710_s27 = smov 96   ;;  %v1564_v42 = vld [vmem:[%s1860_s23 + $0x18] sm:$0xff]  }
  0x1e   : > { %s335_s13 = scalar_lea.vmem %s2093_s0, %s1293_s17  ;;  %1400 = vmatpush3.bf16.msra.mxu1 %v1561_v12  ;;  %s1711_s10 = smov 64   ;;  %v1565_v44 = vld [vmem:[%s1860_s23 + $0x10] sm:$0xff]  }
  0x1f   : > { %1382 = vmatpush3.bf16.msra.mxu0 %v1554_v2  ;;  %v1882_v9 = vld [vmem:[%s335_s13] sm:$0xff]  ;;  %v1884_v10 = vld [vmem:[%s335_s13 + $0x8] sm:$0xff]  ;;  %1401 = vmatprep.subr.bf16.mxu1 %v1708_v1  ;;  %s1340_s18 = sshll.u32 %s1849_s16, 3  ;;  %s1712_s16 = smov 32  }
  0x20   : > { %1383 = vmatprep.subr.bf16.mxu0 %v1708_v1  ;;  %v351_v11 = vpack.c.bf16 %v1884_v10, %v1882_v9  ;;  %s346_s21 = scalar_lea.vmem %s2095_s2, %s1340_s18 }
  0x21   : > { %v1914_v35 = vld [vmem:[%s346_s21] sm:$0xff]   ;;  %s1176_s21 = sadd.s32 %s1335_s30, %s1838_s9 }
  0x22   : > { %1402 = vmatpush3.bf16.msra.mxu1 %v1562_v13  ;;  %v1566_v13 = vld [vmem:[%s1860_s23 + $0x28] sm:$0xff]  }
  0x23   : > { %1384 = vmatpush3.bf16.msra.mxu0 %v1555_v3  ;;  %1407 = vmatprep.subr.bf16.mxu1 %v1708_v1 }
  0x24   : > { %1385 = vmatprep.subr.bf16.mxu0 %v1708_v1 }
  0x27   : > { %1386 = vmatpush3.bf16.msra.mxu0 %v1556_v4 }
  0x28   : > { %1387 = vmatprep.subr.bf16.mxu0 %v1708_v1 }
  0x2b   : > { %1388 = vmatpush3.bf16.msra.mxu0 %v1557_v5 }
  0x2c   : > { %1389 = vmatprep.subr.bf16.mxu0 %v1708_v1 }
  0x2f   : > { %1390 = vmatpush3.bf16.msra.mxu0 %v1558_v6 }
  0x30   : > { %1391 = vmatprep.subr.bf16.mxu0 %v1708_v1 }
  0x33   : > { %1392 = vmatpush3.bf16.msra.mxu0 %v1559_v7 }
  0x34   : > { %1393 = vmatprep.subr.bf16.mxu0 %v1708_v1 }
  0x37   : > { %1394 = vmatpush3.bf16.msra.mxu0 %v1560_v8 }
  0x38   : > { %1455 = vmatprep.subr.bf16.mxu0 %v1708_v1 }
  0x3a   : > { %1396 = vmatmul.mubr.bf16.vlgmr.msra.gmra.mxu0 %v351_v11 }
  0x3b   : > { %1471 = vmatprep.mubr.msk.bf16.mxu0 %vm1709_vm0, %v1708_v1 }
  0xfa   : > { %v450_v14 = vpop.f32.mrf.mxu0 }
  0xfc   : > { %v1397_v15 = vpop.f32.mrf.mxu0 }
  0xfd   : > { %v1567_v15 = vld [vmem:[%s1860_s23 + $0x20] sm:$0xff]  }
  0xfe   : > { %v453_v16 = vpop.f32.mrf.mxu0 }
  0xff   : > { %v1896_v17 = vpack.c.bf16 %v453_v16, %v450_v14 }
 0x100   : > { %v1398_v18 = vpop.f32.mrf.mxu0 }
 0x101   : > { %1404 = vmatmul.mubr.msk.bf16.vlgmr.msra.gmra.mxu1 %vm488_vm1, %v1896_v17 }
 0x102   : > { %1409 = vmatprep.mubr.msk.bf16.mxu1 %vm1709_vm0, %v1708_v1  ;;  %1408 = vmatpush3.bf16.msra.mxu1 %v1914_v35 }
 0x103   : > { %1413 = vmatprep.subr.bf16.mxu1 %v1708_v1 }
 0x1c1   : > { %v526_v19 = vpop.f32.mrf.mxu1 }
 0x1c2   : > { %v534_v20 = vsel %vm533_vm2, %v526_v19, -inf }
 0x1c3   : > { %535 = vmax.xlane.f32.xlu0 %v534_v20  ;;  %v1405_v21 = vpop.f32.mrf.mxu1 }
 0x1c5   : > { %v529_v22 = vpop.f32.mrf.mxu1 }
 0x1c6   : > { %v537_v23 = vsel %vm533_vm2, %v529_v22, -inf }
 0x1c7   : > { %538 = vmax.xlane.f32.xlu0 %v537_v23  ;;  %v1406_v24 = vpop.f32.mrf.mxu1 }
 0x1dd   : > { %609 = vrot.lane.b32.xlu0 %v1896_v17, %s1710_s27 }
 0x1e1   : > { %738 = vrot.lane.b32.xlu0 %v1896_v17, %s1711_s10 }
 0x24c   : > { %v536_v25 = vpop.xlane.xlu0 %535 }
 0x24d   : > { %v540_v26 = vsub.f32 %v526_v19, %v536_v25 }
 0x24f   : > { %v542_v27 = vmul.f32 1.442695, %v540_v26 }
 0x250   : > { %v539_v28 = vpop.xlane.xlu0 %538 }
 0x251   : > { %1578 = vpow2.f32 %v542_v27  ;;  %v541_v29 = vsub.f32 %v529_v22, %v539_v28 }
 0x253   : > { %v544_v30 = vmul.f32 1.442695, %v541_v29 }
 0x254   : > { %v610_v45 = vpop.permute.xlu0 %609 }
 0x255   : > { %1580 = vpow2.f32 %v544_v30 }
 0x258   : > { %v739_v16 = vpop.permute.xlu0 %738 }
 0x25e   : > { %v1579_v31 = vpop.eup %1578 }
 0x25f   : > { %v546_v32 = vsel %vm533_vm2, %v1579_v31, 0.0 }
 0x260   : > { %547 = vadd.xlane.f32.xlu1 %v546_v32 }
 0x262   : > { %v1581_v33 = vpop.eup %1580 }
 0x263   : > { %v549_v34 = vsel %vm533_vm2, %v1581_v33, 0.0 }
 0x264   : > { %550 = vadd.xlane.f32.xlu1 %v549_v34 }
 0x2e9   : > { %v548_v36 = vpop.xlane.xlu1 %547 }
 0x2ea   : > { %1582 = vrcp.f32 %v548_v36 }
 0x2ed   : > { %v551_v37 = vpop.xlane.xlu1 %550 }
 0x2ee   : > { %1584 = vrcp.f32 %v551_v37 }
 0x2f7   : > { %v1583_v38 = vpop.eup %1582 }
 0x2f8   : > { %v553_v40 = vmul.f32 %v1583_v38, %v1579_v31 }
 0x2fb   : > { %v1585_v39 = vpop.eup %1584 }
 0x2fc   : > { %v555_v41 = vmul.f32 %v1585_v39, %v1581_v33 }
 0x2fe   : > { %v556_v43 = vpack.c.bf16 %v555_v41, %v553_v40 }
 0x300   : > { %1410 = vmatmul.mubr.msk.bf16.vlgmr.msra.gmra.mxu1 %vm533_vm2, %v556_v43 }
 0x301   : > { %1414 = vmatpush3.bf16.msra.mxu1 %v1564_v42  ;;  %1417 = vmatprep.mubr.msk.bf16.mxu1 %vm1709_vm0, %v1708_v1 }
 0x302   : > { %1415 = vmatprep.subr.bf16.mxu1 %v1708_v1 }
 0x305   : > { %1416 = vmatpush3.bf16.msra.mxu1 %v1565_v44 }
 0x306   : > { %1421 = vmatprep.subr.bf16.mxu1 %v1708_v1 }
 0x308   : > { %1418 = vmatmul.mubr.msk.bf16.vlgmr.msra.gmra.mxu1 %vm488_vm1, %v610_v45 }
 0x309   : > { %1423 = vmatprep.mubr.msk.bf16.mxu1 %vm1709_vm0, %v1708_v1 }
 0x3c0   : > { %v1928_v46 = vpop.f32.mrf.mxu1 }
 0x3c2   : > { %v1411_v47 = vpop.f32.mrf.mxu1 }
 0x3c3   : > { %v1568_v47 = vld [vmem:[%s1860_s23 + $0x38] sm:$0xff]  }
 0x3c4   : > { %v1930_v48 = vpop.f32.mrf.mxu1 }
 0x3c5   : > { %v607_v49 = vpack.c.bf16 %v1930_v48, %v1928_v46 }
 0x3c6   : > { %v1412_v50 = vpop.f32.mrf.mxu1 }
 0x3c8   : > { %v660_v51 = vpop.f32.mrf.mxu1 }
 0x3c9   : > { %v667_v52 = vsel %vm533_vm2, %v660_v51, -inf }
 0x3ca   : > { %668 = vmax.xlane.f32.xlu1 %v667_v52  ;;  %v1419_v53 = vpop.f32.mrf.mxu1 }
 0x3cc   : > { %v663_v54 = vpop.f32.mrf.mxu1 }
 0x3cd   : > { %v670_v55 = vsel %vm533_vm2, %v663_v54, -inf }
 0x3ce   : > { %671 = vmax.xlane.f32.xlu1 %v670_v55  ;;  %v1420_v56 = vpop.f32.mrf.mxu1 }
 0x453   : > { %v669_v57 = vpop.xlane.xlu1 %668 }
 0x454   : > { %v673_v58 = vsub.f32 %v660_v51, %v669_v57  ;;  %v1569_v51 = vld [vmem:[%s1860_s23 + $0x30] sm:$0xff]  }
 0x456   : > { %v675_v59 = vmul.f32 1.442695, %v673_v58 }
 0x457   : > { %v672_v60 = vpop.xlane.xlu1 %671 }
 0x458   : > { %1586 = vpow2.f32 %v675_v59  ;;  %v674_v61 = vsub.f32 %v663_v54, %v672_v60 }
 0x45a   : > { %v677_v62 = vmul.f32 1.442695, %v674_v61 }
 0x45c   : > { %1588 = vpow2.f32 %v677_v62 }
 0x465   : > { %v1587_v63 = vpop.eup %1586 }
 0x466   : > { %v679_v0 = vsel %vm533_vm2, %v1587_v63, 0.0 }
 0x467   : > { %680 = vadd.xlane.f32.xlu1 %v679_v0 }
 0x469   : > { %v1589_v2 = vpop.eup %1588 }
 0x46a   : > { %v682_v3 = vsel %vm533_vm2, %v1589_v2, 0.0 }
 0x46b   : > { %683 = vadd.xlane.f32.xlu1 %v682_v3 }
 0x47c   : > { %690 = vrot.lane.b32.xlu1 %v1914_v35, %s1710_s27 }
 0x4f0   : > { %v681_v4 = vpop.xlane.xlu1 %680 }
 0x4f1   : > { %1590 = vrcp.f32 %v681_v4 }
 0x4f4   : > { %v684_v5 = vpop.xlane.xlu1 %683 }
 0x4f5   : > { %1592 = vrcp.f32 %v684_v5 }
 0x4f8   : > { %v691_v6 = vpop.permute.xlu1 %690 }
 0x4f9   : > { %1422 = vmatpush3.bf16.msra.mxu1 %v691_v6 }
 0x4fa   : > { %1427 = vmatprep.subr.bf16.mxu1 %v1708_v1 }
 0x4fe   : > { %v1591_v7 = vpop.eup %1590 }
 0x4ff   : > { %v686_v11 = vmul.f32 %v1591_v7, %v1587_v63 }
 0x502   : > { %v1593_v8 = vpop.eup %1592 }
 0x503   : > { %v688_v12 = vmul.f32 %v1593_v8, %v1589_v2 }
 0x505   : > { %v689_v14 = vpack.c.bf16 %v688_v12, %v686_v11 }
 0x507   : > { %1424 = vmatmul.mubr.msk.bf16.vlgmr.msra.gmra.mxu1 %vm533_vm2, %v689_v14 }
 0x508   : > { %1428 = vmatpush3.bf16.msra.mxu1 %v1566_v13  ;;  %1431 = vmatprep.mubr.msk.bf16.mxu1 %vm1709_vm0, %v1708_v1 }
 0x509   : > { %1429 = vmatprep.subr.bf16.mxu1 %v1708_v1 }
 0x50c   : > { %1430 = vmatpush3.bf16.msra.mxu1 %v1567_v15 }
 0x50d   : > { %1435 = vmatprep.subr.bf16.mxu1 %v1708_v1 }
 0x50f   : > { %1432 = vmatmul.mubr.msk.bf16.vlgmr.msra.gmra.mxu1 %vm488_vm1, %v739_v16 }
 0x510   : > { %1437 = vmatprep.mubr.msk.bf16.mxu1 %vm1709_vm0, %v1708_v1 }
 0x5c7   : > { %v1951_v18 = vpop.f32.mrf.mxu1 }
 0x5c9   : > { %v1425_v19 = vpop.f32.mrf.mxu1 }
 0x5cb   : > { %v1953_v20 = vpop.f32.mrf.mxu1 }
 0x5cc   : > { %v737_v21 = vpack.c.bf16 %v1953_v20, %v1951_v18  ;;  %v1571_v18 = vld [vmem:[%s2097_s4 + $0x30] sm:$0xff]   ;;  %v1572_v20 = vld [vmem:[%s2097_s4 + $0x28] sm:$0xff]  }
 0x5cd   : > { %v1426_v22 = vpop.f32.mrf.mxu1 }
 0x5cf   : > { %v789_v23 = vpop.f32.mrf.mxu1 }
 0x5d0   : > { %v796_v24 = vsel %vm533_vm2, %v789_v23, -inf }
 0x5d1   : > { %797 = vmax.xlane.f32.xlu0 %v796_v24  ;;  %v1433_v25 = vpop.f32.mrf.mxu1  ;;  %v1570_v24 = vld [vmem:[%s2097_s4 + $0x38] sm:$0xff]  }
 0x5d2   : > { %1456 = vmatpush3.bf16.msra.mxu0 %v1570_v24  ;;  %v1574_v25 = vld [vmem:[%s2097_s4 + $0x18] sm:$0xff]  }
 0x5d3   : > { %v792_v26 = vpop.f32.mrf.mxu1  ;;  %1457 = vmatprep.subr.bf16.mxu0 %v1708_v1 }
 0x5d4   : > { %v799_v27 = vsel %vm533_vm2, %v792_v26, -inf }
 0x5d5   : > { %800 = vmax.xlane.f32.xlu1 %v799_v27  ;;  %v1434_v28 = vpop.f32.mrf.mxu1  ;;  %v1576_v27 = vld [vmem:[%s2097_s4 + $0x8] sm:$0xff]  }
 0x5d6   : > { %1458 = vmatpush3.bf16.msra.mxu0 %v1571_v18  ;;  %v1577_v28 = vld [vmem:[%s2097_s4] sm:$0xff]  }
 0x5d7   : > { %1459 = vmatprep.subr.bf16.mxu0 %v1708_v1 }
 0x5da   : > { %1460 = vmatpush3.bf16.msra.mxu0 %v1572_v20 }
 0x5db   : > { %1461 = vmatprep.subr.bf16.mxu0 %v1708_v1 }
 0x5e6   : > { %867 = vrot.lane.b32.xlu1 %v1896_v17, %s1712_s16 }
 0x65a   : > { %v798_v29 = vpop.xlane.xlu0 %797 }
 0x65b   : > { %v802_v30 = vsub.f32 %v789_v23, %v798_v29 }
 0x65d   : > { %v804_v31 = vmul.f32 1.442695, %v802_v30 }
 0x65e   : > { %v801_v32 = vpop.xlane.xlu1 %800 }
 0x65f   : > { %1594 = vpow2.f32 %v804_v31  ;;  %v803_v33 = vsub.f32 %v792_v26, %v801_v32  ;;  %v1575_v26 = vld [vmem:[%s2097_s4 + $0x10] sm:$0xff]  }
 0x661   : > { %v806_v34 = vmul.f32 1.442695, %v803_v33 }
 0x662   : > { %v868_v52 = vpop.permute.xlu1 %867 }
 0x663   : > { %1596 = vpow2.f32 %v806_v34 }
 0x66c   : > { %v1595_v36 = vpop.eup %1594 }
 0x66d   : > { %v808_v37 = vsel %vm533_vm2, %v1595_v36, 0.0 }
 0x66e   : > { %809 = vadd.xlane.f32.xlu0 %v808_v37 }
 0x670   : > { %v1597_v38 = vpop.eup %1596 }
 0x671   : > { %v811_v39 = vsel %vm533_vm2, %v1597_v38, 0.0 }
 0x672   : > { %812 = vadd.xlane.f32.xlu0 %v811_v39 }
 0x688   : > { %819 = vrot.lane.b32.xlu0 %v1914_v35, %s1711_s10 }
 0x6f7   : > { %v810_v17 = vpop.xlane.xlu0 %809 }
 0x6f8   : > { %1598 = vrcp.f32 %v810_v17 }
 0x6fb   : > { %v813_v40 = vpop.xlane.xlu0 %812 }
 0x6fc   : > { %1600 = vrcp.f32 %v813_v40 }
 0x6ff   : > { %v820_v41 = vpop.permute.xlu0 %819 }
 0x700   : > { %1436 = vmatpush3.bf16.msra.mxu1 %v820_v41 }
 0x701   : > { %1441 = vmatprep.subr.bf16.mxu1 %v1708_v1 }
 0x705   : > { %v1599_v42 = vpop.eup %1598 }
 0x706   : > { %v815_v44 = vmul.f32 %v1599_v42, %v1595_v36 }
 0x709   : > { %v1601_v43 = vpop.eup %1600 }
 0x70a   : > { %v817_v45 = vmul.f32 %v1601_v43, %v1597_v38 }
 0x70c   : > { %v818_v50 = vpack.c.bf16 %v817_v45, %v815_v44 }
 0x70e   : > { %1438 = vmatmul.mubr.msk.bf16.vlgmr.msra.gmra.mxu1 %vm533_vm2, %v818_v50 }
 0x70f   : > { %1442 = vmatpush3.bf16.msra.mxu1 %v1568_v47  ;;  %1445 = vmatprep.mubr.msk.bf16.mxu1 %vm1709_vm0, %v1708_v1 }
 0x710   : > { %1443 = vmatprep.subr.bf16.mxu1 %v1708_v1 }
 0x713   : > { %1444 = vmatpush3.bf16.msra.mxu1 %v1569_v51 }
 0x714   : > { %1449 = vmatprep.subr.bf16.mxu1 %v1708_v1 }
 0x716   : > { %1446 = vmatmul.mubr.msk.bf16.vlgmr.msra.gmra.mxu1 %vm488_vm1, %v868_v52 }
 0x717   : > { %1451 = vmatprep.mubr.msk.bf16.mxu1 %vm1709_vm0, %v1708_v1 }
 0x7ce   : > { %v859_v53 = vpop.f32.mrf.mxu1 }
 0x7d0   : > { %v1439_v54 = vpop.f32.mrf.mxu1 }
 0x7d2   : > { %v862_v55 = vpop.f32.mrf.mxu1 }
 0x7d3   : > { %v866_v63 = vpack.c.bf16 %v862_v55, %v859_v53 }
 0x7d4   : > { %v1440_v56 = vpop.f32.mrf.mxu1 }
 0x7d6   : > { %v918_v57 = vpop.f32.mrf.mxu1 }
 0x7d7   : > { %v925_v58 = vsel %vm533_vm2, %v918_v57, -inf }
 0x7d8   : > { %926 = vmax.xlane.f32.xlu1 %v925_v58  ;;  %v1447_v59 = vpop.f32.mrf.mxu1  ;;  %v1331_v58 = vld [vmem:[%s2098_s5] ss:$0 sm:$0xff] }
 0x7da   : > { %v921_v60 = vpop.f32.mrf.mxu1 }
 0x7db   : > { %v928_v61 = vsel %vm533_vm2, %v921_v60, -inf }
 0x7dc   : > { %929 = vmax.xlane.f32.xlu0 %v928_v61  ;;  %v1448_v62 = vpop.f32.mrf.mxu1 }
 0x7e9   : > { %948 = vrot.lane.b32.xlu1 %v1914_v35, %s1712_s16 }
 0x7ed   : > { %1000 = vrot.lane.b32.xlu1 %v866_v63, %s1711_s10  ;;  %s1618_s10 = sshll.u32 %s1713_s11, 4  ;;  %s1619_s10 = int_to_ptr.vmem [resolvable:$false] %s1618_s10 }
 0x861   : > { %v927_v0 = vpop.xlane.xlu1 %926 }
 0x862   : > { %v931_v2 = vsub.f32 %v918_v57, %v927_v0 }
 0x864   : > { %v933_v3 = vmul.f32 1.442695, %v931_v2 }
 0x865   : > { %v949_v4 = vpop.permute.xlu1 %948  ;;  %v930_v5 = vpop.xlane.xlu0 %929 }
 0x866   : > { %1602 = vpow2.f32 %v933_v3  ;;  %v932_v6 = vsub.f32 %v921_v60, %v930_v5  ;;  %1450 = vmatpush3.bf16.msra.mxu1 %v949_v4  ;;  %v1332_v60 = vld [vmem:[%s2099_s6] ss:$0 sm:$0xff] }
 0x868   : > { %v935_v7 = vmul.f32 1.442695, %v932_v6 }
 0x869   : > { %v1001_v36 = vpop.permute.xlu1 %1000 }
 0x86a   : > { %1604 = vpow2.f32 %v935_v7 }
 0x873   : > { %v1603_v8 = vpop.eup %1602 }
 0x874   : > { %v937_v11 = vsel %vm533_vm2, %v1603_v8, 0.0 }
 0x875   : > { %938 = vadd.xlane.f32.xlu0 %v937_v11 }
 0x877   : > { %v1605_v12 = vpop.eup %1604 }
 0x878   : > { %v940_v35 = vsel %vm533_vm2, %v1605_v12, 0.0 }
 0x879   : > { %941 = vadd.xlane.f32.xlu0 %v940_v35 }
 0x88f   : > { %997 = vrot.lane.b32.xlu0 %v737_v21, %s1712_s16  ;;  %v1573_v21 = vld [vmem:[%s2097_s4 + $0x20] sm:$0xff]   ;;  %s1336_s16 = sshll.u32 %s1176_s21, 7 }
 0x890   : > { %1462 = vmatpush3.bf16.msra.mxu0 %v1573_v21  ;;  %s2038_s13 = scalar_lea.hbm %s2100_s7, %s1336_s16 }
 0x891   : > { %1463 = vmatprep.subr.bf16.mxu0 %v1708_v1 }
 0x894   : > { %1464 = vmatpush3.bf16.msra.mxu0 %v1574_v25 }
 0x895   : > { %1465 = vmatprep.subr.bf16.mxu0 %v1708_v1 }
 0x898   : > { %1466 = vmatpush3.bf16.msra.mxu0 %v1575_v26 }
 0x899   : > { %1467 = vmatprep.subr.bf16.mxu0 %v1708_v1 }
 0x89c   : > { %1468 = vmatpush3.bf16.msra.mxu0 %v1576_v27 }
 0x89d   : > { %1469 = vmatprep.subr.bf16.mxu0 %v1708_v1 }
 0x8a0   : > { %1470 = vmatpush3.bf16.msra.mxu0 %v1577_v28 }
 0x8fe   : > { %v939_v13 = vpop.xlane.xlu0 %938 }
 0x8ff   : > { %1606 = vrcp.f32 %v939_v13 }
 0x902   : > { %v942_v14 = vpop.xlane.xlu0 %941 }
 0x903   : > { %1608 = vrcp.f32 %v942_v14 }
 0x906   : > { %v998_v34 = vpop.permute.xlu0 %997 }
 0x907   : > { %v1007_v37 = vsel %vm488_vm1, %v607_v49, %v998_v34 }
 0x908   : > { %v1010_v38 = vsel %vm1008_vm3, %v1007_v37, %v1001_v36 }
 0x90c   : > { %v1607_v15 = vpop.eup %1606 }
 0x90d   : > { %v944_v19 = vmul.f32 %v1607_v15, %v1603_v8 }
 0x910   : > { %v1609_v16 = vpop.eup %1608 }
 0x911   : > { %v946_v22 = vmul.f32 %v1609_v16, %v1605_v12 }
 0x913   : > { %v947_v23 = vpack.c.bf16 %v946_v22, %v944_v19 }
 0x915   : > { %1452 = vmatmul.mubr.msk.bf16.vlgmr.msra.gmra.mxu1 %vm533_vm2, %v947_v23 }
 0x9d5   : > { %v988_v29 = vpop.f32.mrf.mxu1 }
 0x9d7   : > { %v1453_v30 = vpop.f32.mrf.mxu1 }
 0x9d9   : > { %v991_v31 = vpop.f32.mrf.mxu1 }
 0x9da   : > { %v995_v32 = vpack.c.bf16 %v991_v31, %v988_v29 }
 0x9db   : > { %v1454_v33 = vpop.f32.mrf.mxu1 }
 0x9dc   : > { %1003 = vrot.lane.b32.xlu1 %v995_v32, %s1710_s27  ;;  %s324_s27 = sand.u32 1, %s1682_s25  }
 0x9dd   : > { %s1290_s18 = sshll.u32 %s324_s27, 4  ;;  %s2042_s9 = scalar_lea.sflag [#allocation3], %s324_s27 }
 0x9de   : > { %s326_s23 = scalar_lea.vmem [#allocation2], %s1290_s18  ;;  %s1620_s18 = scalar_lea.vmem %s1619_s10, 512 }
 0x9df   : > { %s1179_s28 = sshll.u32 %s326_s23, 4  ;;  %s2040_s28 = int_to_ptr.vmem [resolvable:$true] %s1179_s28 }
 0x9e0   : > { %s1614_s30 = scalar_lea.vmem %s2040_s28, 256  ;;  %p1621_p4 = scmp.lt.s32.totalorder %s2040_s28, %s1619_s10 }
 0x9e1   : > { %p1615_p0 = scmp.ne.s32.totalorder %s2040_s28, %s1614_s30  ;;  %p1622_p5 = scmp.lt.s32.totalorder %s1620_s18, %s1614_s30 }
 0x9e3   : > { %p1616_p1 = pnand %p1615_p0, %p1807_p3  ;;  %p1623_p6 = por %p1622_p5, %p1621_p4 }
 0x9e5   : > { %p1617_p2 = pneg %p1616_p1 }
 0x9e7   : > { %p1624_p7 = pnand %p1623_p6, %p1617_p2 }
 0xa4e   : > { %v1004_v39 = vpop.permute.xlu1 %1003 }
 0xa4f   : > { %v1013_v1 = vsel %vm1011_vm4, %v1010_v38, %v1004_v39 }
 0xa50   : > { %1472 = vmatmul.mubr.bf16.vlgmr.msra.gmra.mxu0 %v1013_v1 }
 0xb10   : > { %v1113_v17 = vpop.f32.mrf.mxu0 }
 0xb11   : > { %v1114_v40 = vadd.f32 %v1113_v17, %v1882_v9 }
 0xb12   : > { %v1473_v41 = vpop.f32.mrf.mxu0 }
 0xb13   : > { %1120 = vadd.xlane.f32.xlu1 %v1114_v40 }
 0xb14   : > { %v1116_v42 = vpop.f32.mrf.mxu0 }
 0xb15   : > { %v1117_v43 = vadd.f32 %v1116_v42, %v1884_v10 }
 0xb16   : > { %v1474_v44 = vpop.f32.mrf.mxu0 }
 0xb17   : > { %1122 = vadd.xlane.f32.xlu0 %v1117_v43 }
 0xb9c   : > { %v1121_v45 = vpop.xlane.xlu1 %1120 }
 0xb9d   : > { %v1125_v46 = vmul.f32 0.0078125, %v1121_v45 }
 0xb9f   : > { %v1127_v48 = vsub.f32 %v1114_v40, %v1125_v46 }
 0xba0   : > { %v1123_v49 = vpop.xlane.xlu0 %1122 }
 0xba1   : > { %v1126_v47 = vmul.f32 0.0078125, %v1123_v49  ;;  %v1129_v50 = vmul.f32 %v1127_v48, %v1127_v48 }
 0xba3   : > { %v1128_v51 = vsub.f32 %v1117_v43, %v1126_v47  ;;  %1131 = vadd.xlane.f32.xlu0 %v1129_v50 }
 0xba5   : > { %v1130_v52 = vmul.f32 %v1128_v51, %v1128_v51 }
 0xba7   : > { %1133 = vadd.xlane.f32.xlu0 %v1130_v52 }
 0xc2c   : > { %v1132_v9 = vpop.xlane.xlu0 %1131 }
 0xc2d   : > { %v1135_v53 = vmul.f32 0.0078125, %v1132_v9 }
 0xc2f   : > { %v1137_v54 = vadd.f32 1e-05, %v1135_v53 }
 0xc30   : > { %v1134_v55 = vpop.xlane.xlu0 %1133 }
 0xc31   : > { %1610 = vrsqrt.f32 %v1137_v54  ;;  %v1136_v10 = vmul.f32 0.0078125, %v1134_v55 }
 0xc33   : > { %v1138_v56 = vadd.f32 1e-05, %v1136_v10 }
 0xc35   : > { %1612 = vrsqrt.f32 %v1138_v56 }
 0xc3e   : > { %v1611_v57 = vpop.eup %1610 }
 0xc3f   : > { %v1141_v59 = vmul.f32 %v1611_v57, %v1127_v48 }
 0xc41   : > { %v1150_v61 = vmul.f32 %v1331_v58, %v1141_v59 }
 0xc42   : > { %v1613_v62 = vpop.eup %1612 }
 0xc43   : > { %v1142_v63 = vmul.f32 %v1613_v62, %v1128_v51  ;;  %v1159_v0 = vadd.f32 %v1332_v60, %v1150_v61 }
 0xc45   : > { %v1151_v2 = vmul.f32 %v1331_v58, %v1142_v63  ;;  %1161 = vst [vmem:[%s326_s23] sm:$0xff] %v1159_v0 }
 0xc47   : > { %v1160_v3 = vadd.f32 %v1332_v60, %v1151_v2 }
 0xc49   : > { %1162 = vst [vmem:[%s326_s23 + $0x8] sm:$0xff] %v1160_v3 }
 0xc4a   : > { %1627 = shalt.err (!%p1624_p7)
}
 0xc4b   : > { %s1628_s27 = scalar_lea.hbm %s2038_s13, 256  ;;  %s1632_s21 = scalar_lea.hbm %s2100_s7, 1024 }
 0xc4c   : > { %p1629_p9 = scmp.ne.s32.totalorder %s2038_s13, %s1628_s27  ;;  %p1633_p12 = scmp.lt.s32.totalorder %s2038_s13, %s2100_s7 }
 0xc4d   : > { %p1634_p13 = scmp.lt.s32.totalorder %s1632_s21, %s1628_s27 }
 0xc4e   : > { %p1630_p10 = pnand %p1629_p9, %p1807_p3 }
 0xc4f   : > { %p1635_p0 = por %p1634_p13, %p1633_p12 }
 0xc50   : > { %p1631_p11 = pneg %p1630_p10 }
 0xc52   : > { %p1636_p1 = pnand %p1635_p0, %p1631_p11 }
 0xc54   : > { %1639 = shalt.err (!%p1636_p1)
}
 0xc55   : > { %s1714_s12 = smov 128   ;;  %s1715_s22 = smov 8  }
 0xc56   : > { %1475 = dma.vmem_to_hbm [thread:$0]  (%p1807_p3), %s2040_s28, 256, %s2038_s13, %s2042_s9, %s1714_s12, %s1714_s12, %s1715_s22  }
 0xc57 PF: > { %p1481_p2 = scmp.ge.s32.totalorder %s1706_s8, 2  ;;  %s1194_s30 = sand.u32 1, %s1678_s24  }
 0xc58   : > { %s1195_s11 = scalar_lea.sflag [#allocation3], %s1194_s30 }
 0xc59   : > { %p1478_p4 = pnand %p1481_p2, %p1816_p8 }
 0xc5b   : > { %p1479_p5 = pneg %p1478_p4 }
 0xc5d   : > { %1673 = dma.done.wait (%p1479_p5), %s1195_s11, 256  }
 0xc5e   : > { %1675 = vsyncadd (%p1479_p5), %s1195_s11, 4294967040  ;;  %s20_s8 = sadd.s32 1, %s1706_s8   ;;  %s2109_s28 = sld [smem:[#allocation5_spill]] }
 0xc5f   : > { %p17_p6 = scmp.ge.s32.totalorder %s20_s8, 6   ;;  %s2110_s14 = sld [smem:[#allocation6_spill]] }
 0xc60   : > { %s2111_s30 = sld [smem:[#allocation7_spill]]  ;;  %s2112_s24 = smov %s1682_s25 }
 0xc61   : > { %s2113_s25 = smov %s1686_s26  ;;  %s2114_s26 = smov %s1825_s19 }
 0xc62   : > { %s2115_s27 = smov %s1698_s29  ;;  %19 = sbr.rel (!%p17_p6) target bundleno = 5 (0x5), region = 89 }
 0xc65   : > { %s2116_s29 = smov %s2110_s14 }
 0xc67   :  { %1200 = vsyncpa [#allocation3], 1 }
 0xc68   :  { %1202 = vsyncpa [#allocation3 + $0x1], 1 }

</bundles_post_ra>
